<compile_context>
chip_gen: v6e
topology: v6e:2x2x1
jax: 0.10.0
libtpu: 0.0.40
codegen_flags: <defaults>
</compile_context>

<pallas_src>
import math

import jax
import jax.numpy as jnp
from jax.experimental import pallas as pl
from jax.experimental.pallas import tpu as pltpu

LOG_2PI = math.log(2.0 * math.pi)


# ----------------------------------------------------------------------------
# Kernel
# ----------------------------------------------------------------------------
def actor_critic_kernel(state_ref, action_ref,
                        w1_ref, b1_ref, w2_ref, b2_ref, w3_ref, b3_ref,
                        inv_var_ref, out_ref):
    state = state_ref[...]            # [tb, S]
    action = action_ref[...]          # [tb, A]
    a_dim = action.shape[-1]

    # Fused actor+critic MLP: three wide matmuls, tanh on the fused hidden acts.
    h1 = jnp.tanh(jnp.dot(state, w1_ref[...],
                          preferred_element_type=jnp.float32) + b1_ref[...])   # [tb, 128]
    h2 = jnp.tanh(jnp.dot(h1, w2_ref[...],
                          preferred_element_type=jnp.float32) + b2_ref[...])   # [tb, 64]
    z3 = jnp.dot(h2, w3_ref[...],
                 preferred_element_type=jnp.float32) + b3_ref[...]             # [tb, A+1]

    action_mean = jnp.tanh(z3[:, :a_dim])        # actor head (Tanh)
    value = z3[:, a_dim:a_dim + 1]               # critic head (no Tanh), [tb, 1]

    # Mahalanobis term of the diagonal-covariance Gaussian log_prob.
    diff = action - action_mean
    maha = jnp.sum(diff * diff * inv_var_ref[...], axis=-1, keepdims=True)     # [tb, 1]
    logp_part = -0.5 * maha                       # constant -0.5*(log|Σ|+k*log2π) added in wrapper

    # Single lane-dense output block: lane 0 = logp term, lane 1 = value.
    lane = jax.lax.broadcasted_iota(jnp.int32, out_ref.shape, 1)
    out_ref[...] = jnp.where(lane == 0, logp_part,
                             jnp.where(lane == 1, value, 0.0))


# ----------------------------------------------------------------------------
# Parameters (PyTorch Linear-like uniform init), kept in unfused form.
# ----------------------------------------------------------------------------
def make_params(key, state_dim, action_dim, action_std):
    dims_actor = [(state_dim, 64), (64, 32), (32, action_dim)]
    dims_critic = [(state_dim, 64), (64, 32), (32, 1)]
    params = []
    for fan_in, fan_out in dims_actor + dims_critic:
        key, kw, kb = jax.random.split(key, 3)
        bound = 1.0 / math.sqrt(fan_in)
        w = jax.random.uniform(kw, (fan_in, fan_out), jnp.float32, -bound, bound)
        b = jax.random.uniform(kb, (1, fan_out), jnp.float32, -bound, bound)
        params += [w, b]
    action_var = jnp.full((1, action_dim), action_std * action_std, jnp.float32)
    params.append(action_var)
    return params


# ----------------------------------------------------------------------------
# Wrapper
# ----------------------------------------------------------------------------
def _round_up(x, m):
    return (x + m - 1) // m * m


def _block_diag(a, b):
    m, n = a.shape
    p, q = b.shape
    top = jnp.concatenate([a, jnp.zeros((m, q), a.dtype)], axis=1)
    bot = jnp.concatenate([jnp.zeros((p, n), b.dtype), b], axis=1)
    return jnp.concatenate([top, bot], axis=0)


def _fuse_params(params):
    (wa1, ba1, wa2, ba2, wa3, ba3,
     wc1, bc1, wc2, bc2, wc3, bc3, var) = params
    w1 = jnp.concatenate([wa1, wc1], axis=1)     # [S, 128]
    b1 = jnp.concatenate([ba1, bc1], axis=1)     # [1, 128]
    w2 = _block_diag(wa2, wc2)                   # [128, 64]
    b2 = jnp.concatenate([ba2, bc2], axis=1)     # [1, 64]
    w3 = _block_diag(wa3, wc3)                   # [64, A+1]
    b3 = jnp.concatenate([ba3, bc3], axis=1)     # [1, A+1]
    inv_var = 1.0 / var                          # [1, A]
    log_det = jnp.sum(jnp.log(var))              # scalar
    return (w1, b1, w2, b2, w3, b3, inv_var), log_det


def evaluate(state, action, params, *, tile_b=1024):
    """Returns (action_logprobs [B], state_value [B], dist_entropy [B])."""
    B, S = state.shape
    A = action.shape[1]

    (w1, b1, w2, b2, w3, b3, inv_var), log_det = _fuse_params(params)

    # Batch tile: multiple of 8 sublanes, capped by the (rounded-up) batch.
    tb = min(tile_b, _round_up(B, 8))
    Bp = _round_up(B, tb)
    if Bp != B:
        state = jnp.pad(state, ((0, Bp - B), (0, 0)))
        action = jnp.pad(action, ((0, Bp - B), (0, 0)))

    def pinned(arr):  # resident in VMEM across all grid steps
        return pl.BlockSpec(arr.shape, lambda i: (0, 0))

    out = pl.pallas_call(
        actor_critic_kernel,
        out_shape=jax.ShapeDtypeStruct((Bp, 128), jnp.float32),
        grid=(Bp // tb,),
        in_specs=[
            pl.BlockSpec((tb, S), lambda i: (i, 0)),
            pl.BlockSpec((tb, A), lambda i: (i, 0)),
            pinned(w1), pinned(b1), pinned(w2), pinned(b2),
            pinned(w3), pinned(b3), pinned(inv_var),
        ],
        out_specs=pl.BlockSpec((tb, 128), lambda i: (i, 0)),
        compiler_params=pltpu.CompilerParams(
            dimension_semantics=("parallel",)),
    )(state, action, w1, b1, w2, b2, w3, b3, inv_var)

    out = out[:B]
    logp_const = -0.5 * (log_det + A * LOG_2PI)
    logp = out[:, 0] + logp_const
    value = out[:, 1]
    entropy = jnp.broadcast_to(0.5 * A * (1.0 + LOG_2PI) + 0.5 * log_det, (B,))
    return logp, value, entropy


# ----------------------------------------------------------------------------
# Plain-JAX reference (unfused) for sanity checking.
# ----------------------------------------------------------------------------
def evaluate_ref(state, action, params):
    (wa1, ba1, wa2, ba2, wa3, ba3,
     wc1, bc1, wc2, bc2, wc3, bc3, var) = params
    h = jnp.tanh(state @ wa1 + ba1)
    h = jnp.tanh(h @ wa2 + ba2)
    mean = jnp.tanh(h @ wa3 + ba3)
    k = action.shape[-1]
    diff = action - mean
    log_det = jnp.sum(jnp.log(var))
    logp = -0.5 * (jnp.sum(diff * diff / var, axis=-1) + log_det + k * LOG_2PI)
    ent = jnp.full((state.shape[0],), 0.5 * k * (1.0 + LOG_2PI) + 0.5 * log_det)
    c = jnp.tanh(state @ wc1 + bc1)
    c = jnp.tanh(c @ wc2 + bc2)
    val = (c @ wc3 + bc3)[:, 0]
    return logp, val, ent


if __name__ == "__main__":
    # B=48 with tile_b=32 exercises multiple grid steps + a padded final tile.
    B, state_dim, action_dim, action_std = 48, 16, 4, 0.5

    key = jax.random.PRNGKey(0)
    key, ks, ka = jax.random.split(key, 3)
    state = jax.random.normal(ks, (B, state_dim), jnp.float32)
    action = jax.random.normal(ka, (B, action_dim), jnp.float32)
    params = make_params(key, state_dim, action_dim, action_std)

    logp, value, entropy = evaluate(state, action, params, tile_b=32)
    jax.block_until_ready((logp, value, entropy))

    logp_r, value_r, entropy_r = evaluate_ref(state, action, params)
    assert jnp.allclose(logp, logp_r, atol=1e-4), "logprob mismatch"
    assert jnp.allclose(value, value_r, atol=1e-4), "value mismatch"
    assert jnp.allclose(entropy, entropy_r, atol=1e-4), "entropy mismatch"

    print("KERNEL_OK")
</pallas_src>

<mosaic_0001>
module attributes {stable_mosaic.version = 11 : i64} {
  func.func @actor_critic_kernel(%arg0: i32, %arg1: memref<32x16xf32, #tpu.memory_space<vmem>>, %arg2: memref<32x4xf32, #tpu.memory_space<vmem>>, %arg3: memref<16x128xf32, #tpu.memory_space<vmem>>, %arg4: memref<1x128xf32, #tpu.memory_space<vmem>>, %arg5: memref<128x64xf32, #tpu.memory_space<vmem>>, %arg6: memref<1x64xf32, #tpu.memory_space<vmem>>, %arg7: memref<64x5xf32, #tpu.memory_space<vmem>>, %arg8: memref<1x5xf32, #tpu.memory_space<vmem>>, %arg9: memref<1x4xf32, #tpu.memory_space<vmem>>, %arg10: memref<32x128xf32, #tpu.memory_space<vmem>>) attributes {dimension_semantics = [#tpu.dimension_semantics<parallel>], iteration_bounds = array<i64: 2>, scalar_prefetch = 0 : i64, scratch_operands = 0 : i64, tpu.core_type = #tpu.core_type<tc>, window_params = [{transform_indices = @transform_0, window_bounds = array<i64: 32, 16>}, {transform_indices = @transform_1, window_bounds = array<i64: 32, 4>}, {pipeline_mode = #tpu.pipeline_mode<synchronous>, transform_indices = @transform_2, window_bounds = array<i64: 16, 128>}, {pipeline_mode = #tpu.pipeline_mode<synchronous>, transform_indices = @transform_3, window_bounds = array<i64: 1, 128>}, {pipeline_mode = #tpu.pipeline_mode<synchronous>, transform_indices = @transform_4, window_bounds = array<i64: 128, 64>}, {pipeline_mode = #tpu.pipeline_mode<synchronous>, transform_indices = @transform_5, window_bounds = array<i64: 1, 64>}, {pipeline_mode = #tpu.pipeline_mode<synchronous>, transform_indices = @transform_6, window_bounds = array<i64: 64, 5>}, {pipeline_mode = #tpu.pipeline_mode<synchronous>, transform_indices = @transform_7, window_bounds = array<i64: 1, 5>}, {pipeline_mode = #tpu.pipeline_mode<synchronous>, transform_indices = @transform_8, window_bounds = array<i64: 1, 4>}, {transform_indices = @transform_9, window_bounds = array<i64: 32, 128>}]} {
    %c0 = arith.constant 0 : index
    %c0_0 = arith.constant 0 : index
    %0 = vector.load %arg1[%c0, %c0_0] : memref<32x16xf32, #tpu.memory_space<vmem>>, vector<32x16xf32>
    %c0_1 = arith.constant 0 : index
    %c0_2 = arith.constant 0 : index
    %1 = vector.load %arg2[%c0_1, %c0_2] : memref<32x4xf32, #tpu.memory_space<vmem>>, vector<32x4xf32>
    %c0_3 = arith.constant 0 : index
    %c0_4 = arith.constant 0 : index
    %2 = vector.load %arg3[%c0_3, %c0_4] : memref<16x128xf32, #tpu.memory_space<vmem>>, vector<16x128xf32>
    %cst = arith.constant dense<0.000000e+00> : vector<32x128xf32>
    %3 = tpu.matmul %0, %2, %cst {dimension_numbers = #tpu.dot_dimension_numbers<[1], [0], [0], [1], [0, 0, 1, 1], [], []>} : vector<32x16xf32>, vector<16x128xf32>, vector<32x128xf32> -> vector<32x128xf32>
    %c0_5 = arith.constant 0 : index
    %c0_6 = arith.constant 0 : index
    %4 = vector.load %arg4[%c0_5, %c0_6] : memref<1x128xf32, #tpu.memory_space<vmem>>, vector<1x128xf32>
    %5 = vector.broadcast %4 : vector<1x128xf32> to vector<32x128xf32>
    %6 = arith.addf %3, %5 : vector<32x128xf32>
    %7 = math.tanh %6 : vector<32x128xf32>
    %c0_7 = arith.constant 0 : index
    %c0_8 = arith.constant 0 : index
    %8 = vector.load %arg5[%c0_7, %c0_8] : memref<128x64xf32, #tpu.memory_space<vmem>>, vector<128x64xf32>
    %cst_9 = arith.constant dense<0.000000e+00> : vector<32x64xf32>
    %9 = tpu.matmul %7, %8, %cst_9 {dimension_numbers = #tpu.dot_dimension_numbers<[1], [0], [0], [1], [0, 0, 1, 1], [], []>} : vector<32x128xf32>, vector<128x64xf32>, vector<32x64xf32> -> vector<32x64xf32>
    %c0_10 = arith.constant 0 : index
    %c0_11 = arith.constant 0 : index
    %10 = vector.load %arg6[%c0_10, %c0_11] : memref<1x64xf32, #tpu.memory_space<vmem>>, vector<1x64xf32>
    %11 = vector.broadcast %10 : vector<1x64xf32> to vector<32x64xf32>
    %12 = arith.addf %9, %11 : vector<32x64xf32>
    %13 = math.tanh %12 : vector<32x64xf32>
    %c0_12 = arith.constant 0 : index
    %c0_13 = arith.constant 0 : index
    %14 = vector.load %arg7[%c0_12, %c0_13] : memref<64x5xf32, #tpu.memory_space<vmem>>, vector<64x5xf32>
    %cst_14 = arith.constant dense<0.000000e+00> : vector<32x5xf32>
    %15 = tpu.matmul %13, %14, %cst_14 {dimension_numbers = #tpu.dot_dimension_numbers<[1], [0], [0], [1], [0, 0, 1, 1], [], []>} : vector<32x64xf32>, vector<64x5xf32>, vector<32x5xf32> -> vector<32x5xf32>
    %c0_15 = arith.constant 0 : index
    %c0_16 = arith.constant 0 : index
    %16 = vector.load %arg8[%c0_15, %c0_16] : memref<1x5xf32, #tpu.memory_space<vmem>>, vector<1x5xf32>
    %17 = vector.broadcast %16 : vector<1x5xf32> to vector<32x5xf32>
    %18 = arith.addf %15, %17 : vector<32x5xf32>
    %19 = vector.extract_strided_slice %18 {offsets = [0, 0], sizes = [32, 4], strides = [1, 1]} : vector<32x5xf32> to vector<32x4xf32>
    %20 = math.tanh %19 : vector<32x4xf32>
    %21 = vector.extract_strided_slice %18 {offsets = [0, 4], sizes = [32, 1], strides = [1, 1]} : vector<32x5xf32> to vector<32x1xf32>
    %22 = arith.subf %1, %20 : vector<32x4xf32>
    %23 = arith.mulf %22, %22 : vector<32x4xf32>
    %c0_17 = arith.constant 0 : index
    %c0_18 = arith.constant 0 : index
    %24 = vector.load %arg9[%c0_17, %c0_18] : memref<1x4xf32, #tpu.memory_space<vmem>>, vector<1x4xf32>
    %25 = vector.broadcast %24 : vector<1x4xf32> to vector<32x4xf32>
    %26 = arith.mulf %23, %25 : vector<32x4xf32>
    %cst_19 = arith.constant dense<0.000000e+00> : vector<32xf32>
    %27 = vector.multi_reduction <add>, %26, %cst_19 [1] : vector<32x4xf32> to vector<32xf32>
    %28 = vector.shape_cast %27 : vector<32xf32> to vector<32x1xf32>
    %cst_20 = arith.constant -5.000000e-01 : f32
    %29 = vector.broadcast %cst_20 : f32 to vector<32x1xf32>
    %30 = arith.mulf %29, %28 : vector<32x1xf32>
    %31 = tpu.iota {dimensions = array<i32: 1>} : vector<32x128xi32>
    %c0_i32 = arith.constant 0 : i32
    %32 = vector.broadcast %c0_i32 : i32 to vector<32x128xi32>
    %33 = arith.cmpi eq, %31, %32 : vector<32x128xi32>
    %c1_i32 = arith.constant 1 : i32
    %34 = vector.broadcast %c1_i32 : i32 to vector<32x128xi32>
    %35 = arith.cmpi eq, %31, %34 : vector<32x128xi32>
    %cst_21 = arith.constant 0.000000e+00 : f32
    %36 = vector.shape_cast %21 : vector<32x1xf32> to vector<32x1xf32>
    %37 = vector.broadcast %36 : vector<32x1xf32> to vector<32x128xf32>
    %38 = vector.broadcast %cst_21 : f32 to vector<32x128xf32>
    %39 = arith.select %35, %37, %38 : vector<32x128xi1>, vector<32x128xf32>
    %40 = vector.shape_cast %30 : vector<32x1xf32> to vector<32x1xf32>
    %41 = vector.broadcast %40 : vector<32x1xf32> to vector<32x128xf32>
    %42 = arith.select %33, %41, %39 : vector<32x128xi1>, vector<32x128xf32>
    %c0_22 = arith.constant 0 : index
    %c0_23 = arith.constant 0 : index
    %43 = vector.load %arg10[%c0_22, %c0_23] : memref<32x128xf32, #tpu.memory_space<vmem>>, vector<32x128xf32>
    tpu.vector_store %arg10[%c0_22, %c0_23], %42 {strides = array<i32>} : memref<32x128xf32, #tpu.memory_space<vmem>>, vector<32x128xf32>,
    return
  }
  func.func @transform_0(%arg0: i32) -> (i32, i32) {
    %c0_i32 = arith.constant 0 : i32
    %c0_i32_0 = arith.constant 0 : i32
    return %arg0, %c0_i32 : i32, i32
  }
  func.func @transform_1(%arg0: i32) -> (i32, i32) {
    %c0_i32 = arith.constant 0 : i32
    %c0_i32_0 = arith.constant 0 : i32
    return %arg0, %c0_i32 : i32, i32
  }
  func.func @transform_2(%arg0: i32) -> (i32, i32) {
    %c0_i32 = arith.constant 0 : i32
    %c0_i32_0 = arith.constant 0 : i32
    %c0_i32_1 = arith.constant 0 : i32
    return %c0_i32, %c0_i32_0 : i32, i32
  }
  func.func @transform_3(%arg0: i32) -> (i32, i32) {
    %c0_i32 = arith.constant 0 : i32
    %c0_i32_0 = arith.constant 0 : i32
    %c0_i32_1 = arith.constant 0 : i32
    return %c0_i32, %c0_i32_0 : i32, i32
  }
  func.func @transform_4(%arg0: i32) -> (i32, i32) {
    %c0_i32 = arith.constant 0 : i32
    %c0_i32_0 = arith.constant 0 : i32
    %c0_i32_1 = arith.constant 0 : i32
    return %c0_i32, %c0_i32_0 : i32, i32
  }
  func.func @transform_5(%arg0: i32) -> (i32, i32) {
    %c0_i32 = arith.constant 0 : i32
    %c0_i32_0 = arith.constant 0 : i32
    %c0_i32_1 = arith.constant 0 : i32
    return %c0_i32, %c0_i32_0 : i32, i32
  }
  func.func @transform_6(%arg0: i32) -> (i32, i32) {
    %c0_i32 = arith.constant 0 : i32
    %c0_i32_0 = arith.constant 0 : i32
    %c0_i32_1 = arith.constant 0 : i32
    return %c0_i32, %c0_i32_0 : i32, i32
  }
  func.func @transform_7(%arg0: i32) -> (i32, i32) {
    %c0_i32 = arith.constant 0 : i32
    %c0_i32_0 = arith.constant 0 : i32
    %c0_i32_1 = arith.constant 0 : i32
    return %c0_i32, %c0_i32_0 : i32, i32
  }
  func.func @transform_8(%arg0: i32) -> (i32, i32) {
    %c0_i32 = arith.constant 0 : i32
    %c0_i32_0 = arith.constant 0 : i32
    %c0_i32_1 = arith.constant 0 : i32
    return %c0_i32, %c0_i32_0 : i32, i32
  }
  func.func @transform_9(%arg0: i32) -> (i32, i32) {
    %c0_i32 = arith.constant 0 : i32
    %c0_i32_0 = arith.constant 0 : i32
    return %arg0, %c0_i32 : i32, i32
  }
}

</mosaic_0001>

<bundles_post_ra>
// kernel: tpu_custom_call.1
= control target key start
LH: loop header
LB: loop body
LE: loop exit
PB: predicated region body
PF: predicated region fallthrough
CT: control target
= control target key end

     0   :  { %14 = vsyncpa [#allocation3], 0  ;;  %s1404_s0 = inlined_call_operand.vmem [shape: f32[64,16], index: 0, kind: input, shape index: {}]   ;;  %s1405_s1 = inlined_call_operand.vmem [shape: f32[64,4], index: 1, kind: input, shape index: {}]   ;;  %s1406_s2 = inlined_call_operand.vmem [shape: f32[16,128], index: 2, kind: input, shape index: {}]   ;;  %s1407_s3 = inlined_call_operand.vmem [shape: f32[1,128], index: 3, kind: input, shape index: {}]   ;;  %s1408_s4 = inlined_call_operand.vmem [shape: f32[128,64], index: 4, kind: input, shape index: {}]   ;;  %s1409_s5 = inlined_call_operand.vmem [shape: f32[1,64], index: 5, kind: input, shape index: {}]   ;;  %s1410_s6 = inlined_call_operand.vmem [shape: f32[64,5], index: 6, kind: input, shape index: {}]   ;;  %s1411_s7 = inlined_call_operand.vmem [shape: f32[1,5], index: 7, kind: input, shape index: {}]   ;;  %s1412_s8 = inlined_call_operand.vmem [shape: f32[1,4], index: 8, kind: input, shape index: {}]   ;;  %s1413_s9 = inlined_call_operand.hbm [shape: f32[64,128], index: 9, kind: output, shape index: {}]  }
   0x1   :  { %16 = vsyncpa [#allocation3 + $0x1], 0  ;;  %s1183_s30 = smov 0   ;;  %s1185_s10 = smov 0  }
   0x2   :  { %s1187_s11 = smov 0   ;;  %s1189_s12 = smov 0  }
   0x3 LB: > { %s1204_s13 = sadd.s32 4294967295, %s1127_s12   ;;  %s864_s14 = sadd.s32 4294967294, %s1127_s12   ;;  %s1127_s12 = sphi %s1189_s12, %s1419_s12   ;;  %s1123_s11 = sphi %s1187_s11, %s1418_s11   ;;  %s1119_s10 = sphi %s1185_s10, %s1417_s10   ;;  %s1115_s30 = sphi %s1183_s30, %s1416_s30  }
   0x4   : > { %s1208_s15 = sadd.s32 1, %s1127_s12   ;;  %s228_s16 = sadd.s32 1, %s1123_s11 }
   0x5   : > { %s225_s17 = ssub.s32 %s1127_s12, %s1208_s15  ;;  %p238_p0 = scmp.ne.s32.totalorder %s1123_s11, %s1119_s10 }
   0x6   : > { %p226_p1 = scmp.eq.s32.totalorder %s225_s17, 0  ;;  %p239_p2 = scmp.eq.s32.totalorder %s1204_s13, 1 }
   0x7   : > { %p244_p3 = scmp.ne.s32.totalorder %s1119_s10, %s1115_s30  ;;  %p245_p4 = scmp.eq.s32.totalorder %s864_s14, 1 }
   0x8   : > { %s1219_s18 = scalar_select %p226_p1, %s1123_s11, %s228_s16  }
   0x9   : > { %p1221_p5 = por %p239_p2, %p238_p0  ;;  %p1225_p6 = por %p245_p4, %p244_p3 }
   0xa   : > { %p867_p7 = scmp.ge.s32.totalorder %s1127_s12, 1  ;;  %p302_p8 = scmp.lt.s32.totalorder %s1127_s12, 3 }
   0xc   : > { %p303_p9 = pnand %p867_p7, %p302_p8 }
   0xd   : > { %s869_s25 = sshll.u32 (!%p303_p9), %s1204_s13, 2  ;;  %s890_s14 = sshll.u32 (!%p303_p9), %s1204_s13, 9 }
   0xe   : > { %306 = sbr.rel (%p303_p9) target bundleno = 848 (0x350), region = 56  ;;  %p344_p10 = scmp.lt.s32.totalorder (!%p303_p9), %s869_s25, 7 }
   0xf   : > { %s1358_s21 = scalar_lea.hbm (!%p303_p9), %s1413_s9, %s890_s14 }
  0x13   : > { %v365_v0 = vld [vmem:[%s1406_s2 + $0x8] sm:$0xff]  ;;  %v364_v1 = vld [vmem:[%s1406_s2] sm:$0xff]  ;;  %v490_v2 = vld [vmem:[%s1408_s4 + $0x78] sm:$0xff]  ;;  %s1421_s25 = smov (!%p344_p10, %s869_s25), 7  ;;  %vm373_vm0 = vcmask 130048   ;;  %vm602_vm1 = vcmask 523264  }
  0x14   : > { %929 = vmatprep.subr.mxu0 %v365_v0  ;;  %939 = vmatprep.subr.mxu1 %v490_v2  ;;  %v489_v3 = vld [vmem:[%s1408_s4 + $0x70] sm:$0xff]  ;;  %v488_v4 = vld [vmem:[%s1408_s4 + $0x68] sm:$0xff]  ;;  %v487_v5 = vld [vmem:[%s1408_s4 + $0x60] sm:$0xff]  ;;  %s870_s22 = sshll.u32 %s1421_s25, 3  ;;  %v1129_v56 = vmov 4   ;;  %vm723_vm2 = vcmask 31744  }
  0x15   : > { %930 = vmatpush3.msra.mxu0 %v365_v0  ;;  %940 = vmatpush3.msra.mxu1 %v490_v2  ;;  %s347_s26 = scalar_lea.vmem %s1404_s0, %s870_s22  ;;  %v486_v6 = vld [vmem:[%s1408_s4 + $0x58] sm:$0xff]  ;;  %v485_v10 = vld [vmem:[%s1408_s4 + $0x50] sm:$0xff]  ;;  %v484_v12 = vld [vmem:[%s1408_s4 + $0x48] sm:$0xff]  ;;  %s353_s24 = scalar_lea.vmem %s1405_s1, %s870_s22 }
  0x16   : > { %931 = vmatprep.subr.mxu0 %v364_v1  ;;  %941 = vmatprep.subr.mxu1 %v489_v3  ;;  %v356_v7 = vld [vmem:[%s347_s26] sm:$0xff]  ;;  %v357_v8 = vld [vmem:[%s347_s26 + $0x8] sm:$0xff]  ;;  %v358_v9 = vld [vmem:[%s347_s26 + $0x10] sm:$0xff]  ;;  %s340_s25 = sand.u32 1, %s1119_s10  }
  0x17   : > { %932 = vmatpush3.msra.mxu0 %v364_v1  ;;  %942 = vmatpush3.msra.mxu1 %v489_v3  ;;  %v359_v11 = vld [vmem:[%s347_s26 + $0x18] sm:$0xff]  ;;  %v483_v13 = vld [vmem:[%s1408_s4 + $0x40] sm:$0xff]  ;;  %v481_v15 = vld [vmem:[%s1408_s4 + $0x30] sm:$0xff]  ;;  %s868_s22 = sshll.u32 %s340_s25, 5  ;;  %s1364_s13 = scalar_lea.sflag [#allocation3], %s340_s25 }
  0x18   : > { %943 = vmatprep.subr.mxu1 %v488_v4  ;;  %933 = vmatprep.mubr.msk.f32.mxu0 %vm373_vm0, %v356_v7  ;;  %v482_v14 = vld [vmem:[%s1408_s4 + $0x38] sm:$0xff]  ;;  %v480_v16 = vld [vmem:[%s1408_s4 + $0x28] sm:$0xff]  ;;  %v479_v17 = vld [vmem:[%s1408_s4 + $0x20] sm:$0xff]  ;;  %s342_s28 = scalar_lea.vmem [#allocation2], %s868_s22 }
  0x19   : > { %944 = vmatpush3.msra.mxu1 %v488_v4  ;;  %934 = vmatmul.mubr.msk.f32.vlgmr.msra.gmra.mxu0 %vm373_vm0, %v357_v8  ;;  %v478_v18 = vld [vmem:[%s1408_s4 + $0x18] sm:$0xff]  ;;  %v477_v19 = vld [vmem:[%s1408_s4 + $0x10] sm:$0xff]  ;;  %v476_v20 = vld [vmem:[%s1408_s4 + $0x8] sm:$0xff]  ;;  %s790_s29 = sshll.u32 %s342_s28, 4  ;;  %s1353_s29 = int_to_ptr.vmem [resolvable:$true] %s790_s29 }
  0x1a   : > { %945 = vmatprep.subr.mxu1 %v487_v5  ;;  %936 = vmatprep.mubr.msk.f32.mxu0 %vm373_vm0, %v358_v9  ;;  %v475_v21 = vld [vmem:[%s1408_s4] sm:$0xff]  ;;  %v594_v35 = vld [vmem:[%s1410_s6 + $0x38] sm:$0xff]  ;;  %v593_v36 = vld [vmem:[%s1410_s6 + $0x30] sm:$0xff]  ;;  %s1067_s23 = scalar_lea.vmem %s1353_s29, 512 }
  0x1b   : > { %946 = vmatpush3.msra.mxu1 %v487_v5  ;;  %v873_v22 = vld [vmem:[%s1407_s3] ss:$0 sm:$0xff]  ;;  %977 = vmatprep.subr.mxu0 %v594_v35  ;;  %v592_v37 = vld [vmem:[%s1410_s6 + $0x28] sm:$0xff]  ;;  %v590_v39 = vld [vmem:[%s1410_s6 + $0x18] sm:$0xff]  ;;  %p1068_p11 = scmp.ne.s32.totalorder %s1353_s29, %s1067_s23 }
  0x1c   : > { %947 = vmatprep.subr.mxu1 %v486_v6  ;;  %978 = vmatpush3.msra.mxu0 %v594_v35  ;;  %v591_v38 = vld [vmem:[%s1410_s6 + $0x20] sm:$0xff]  ;;  %v589_v40 = vld [vmem:[%s1410_s6 + $0x10] sm:$0xff]  ;;  %v588_v41 = vld [vmem:[%s1410_s6 + $0x8] sm:$0xff] }
  0x1d   : > { %948 = vmatpush3.msra.mxu1 %v486_v6  ;;  %937 = vmatmul.mubr.msk.f32.gmra.mxu0 %vm373_vm0, %v359_v11  ;;  %v587_v42 = vld [vmem:[%s1410_s6] sm:$0xff]  ;;  %v361_v2 = vld [vmem:[%s353_s24 + $0x8] sm:$0xff]  ;;  %p1069_p12 = pnand %p1068_p11, %p1221_p5 }
  0x1e   : > { %949 = vmatprep.subr.mxu1 %v485_v10  ;;  %979 = vmatprep.subr.mxu0 %v593_v36  ;;  %v878_v43 = vld [vmem:[%s1409_s5] ss:$0 sm:$0xff] }
  0x1f   : > { %950 = vmatpush3.msra.mxu1 %v485_v10  ;;  %980 = vmatpush3.msra.mxu0 %v593_v36  ;;  %v879_v57 = vld [vmem:[%s1411_s7] ss:$0 sm:$0xff]  ;;  %p1070_p13 = pneg %p1069_p12 }
  0x20   : > { %951 = vmatprep.subr.mxu1 %v484_v12  ;;  %981 = vmatprep.subr.mxu0 %v592_v37  ;;  %v360_v4 = vld [vmem:[%s353_s24] sm:$0xff] }
  0x21   : > { %952 = vmatpush3.msra.mxu1 %v484_v12  ;;  %982 = vmatpush3.msra.mxu0 %v592_v37  ;;  %v884_v7 = vld [vmem:[%s1412_s8] ss:$0 sm:$0xff] }
  0x22   : > { %953 = vmatprep.subr.mxu1 %v483_v13  ;;  %983 = vmatprep.subr.mxu0 %v591_v38 }
  0x23   : > { %954 = vmatpush3.msra.mxu1 %v483_v13  ;;  %984 = vmatpush3.msra.mxu0 %v591_v38 }
  0x24   : > { %955 = vmatprep.subr.mxu1 %v482_v14  ;;  %985 = vmatprep.subr.mxu0 %v590_v39 }
  0x25   : > { %956 = vmatpush3.msra.mxu1 %v482_v14  ;;  %986 = vmatpush3.msra.mxu0 %v590_v39 }
  0x26   : > { %957 = vmatprep.subr.mxu1 %v481_v15  ;;  %987 = vmatprep.subr.mxu0 %v589_v40 }
  0x27   : > { %958 = vmatpush3.msra.mxu1 %v481_v15  ;;  %988 = vmatpush3.msra.mxu0 %v589_v40 }
  0x28   : > { %959 = vmatprep.subr.mxu1 %v480_v16  ;;  %989 = vmatprep.subr.mxu0 %v588_v41 }
  0x29   : > { %960 = vmatpush3.msra.mxu1 %v480_v16  ;;  %990 = vmatpush3.msra.mxu0 %v588_v41  ;;  %v363_v16 = vld [vmem:[%s353_s24 + $0x18] sm:$0xff] }
  0x2a   : > { %961 = vmatprep.subr.mxu1 %v479_v17  ;;  %991 = vmatprep.subr.mxu0 %v587_v42 }
  0x2b   : > { %962 = vmatpush3.msra.mxu1 %v479_v17  ;;  %992 = vmatpush3.msra.mxu0 %v587_v42 }
  0x2c   : > { %963 = vmatprep.subr.mxu1 %v478_v18  ;;  %1042 = vset.pattern.permute.xlu1 %v1129_v56 }
  0x2d   : > { %964 = vmatpush3.msra.mxu1 %v478_v18  ;;  %1041 = vset.pattern.permute.xlu0 %v1129_v56 }
  0x2e   : > { %965 = vmatprep.subr.mxu1 %v477_v19 }
  0x2f   : > { %966 = vmatpush3.msra.mxu1 %v477_v19  ;;  %v362_v19 = vld [vmem:[%s353_s24 + $0x10] sm:$0xff]  ;;  %s1130_s24 = smov [#allocation2]  }
  0x30   : > { %967 = vmatprep.subr.mxu1 %v476_v20  ;;  %s1071_s27 = sshll.u32 %s1130_s24, 4  ;;  %s1072_s27 = int_to_ptr.vmem [resolvable:$false] %s1071_s27 }
  0x31   : > { %968 = vmatpush3.msra.mxu1 %v476_v20  ;;  %s1073_s26 = scalar_lea.vmem %s1072_s27, 1024  ;;  %p1074_p0 = scmp.lt.s32.totalorder %s1353_s29, %s1072_s27 }
  0x32   : > { %969 = vmatprep.subr.mxu1 %v475_v21  ;;  %p1075_p1 = scmp.lt.s32.totalorder %s1073_s26, %s1067_s23 }
  0x33   : > { %970 = vmatpush3.msra.mxu1 %v475_v21 }
  0x34   : > { %p1076_p2 = por %p1075_p1, %p1074_p0 }
  0x36   : > { %p1077_p3 = pnand %p1076_p2, %p1070_p13 }
  0xd9   : > { %v935_v23 = vpop.f32.mrf.mxu0 }
  0xda   : > { %v458_v24 = vadd.f32 %v935_v23, %v873_v22 }
  0xdb   : > { %v452_v25 = vpop.f32.mrf.mxu0 }
  0xdc   : > { %v453_v26 = vadd.f32 %v873_v22, %v452_v25 }
  0xdd   : > { %v938_v27 = vpop.f32.mrf.mxu0 }
  0xde   : > { %1043 = vtanh.f32 %v453_v26  ;;  %v468_v28 = vadd.f32 %v938_v27, %v873_v22  ;;  %v740_v27 = vlaneseq }
  0xdf   : > { %1045 = vtanh.f32 %v458_v24  ;;  %v462_v29 = vpop.f32.mrf.mxu0 }
  0xe0   : > { %v463_v30 = vadd.f32 %v873_v22, %v462_v29 }
  0xe2   : > { %1047 = vtanh.f32 %v463_v30 }
  0xe3   : > { %1049 = vtanh.f32 %v468_v28  ;;  %v741_v28 = vand.u32 127, %v740_v27 }
  0xe5   : > { %vm743_vm3 = vcmp.eq.s32.totalorder %v741_v28, 1  ;;  %vm742_vm4 = vcmp.eq.s32.totalorder %v741_v28, 0 }
  0xeb   : > { %v1044_v31 = vpop.eup %1043 }
  0xec   : > { %v1046_v32 = vpop.eup %1045  ;;  %971 = vmatprep.mubr.f32.mxu1 %v1044_v31 }
  0xed   : > { %972 = vmatmul.mubr.f32.vlgmr.msra.gmra.mxu1 %v1046_v32 }
  0xef   : > { %v1048_v33 = vpop.eup %1047 }
  0xf0   : > { %v1050_v34 = vpop.eup %1049  ;;  %974 = vmatprep.mubr.f32.mxu1 %v1048_v33 }
  0xf1   : > { %975 = vmatmul.mubr.f32.gmra.mxu1 %v1050_v34 }
 0x1ad   : > { %v973_v44 = vpop.f32.mrf.mxu1 }
 0x1ae   : > { %v570_v45 = vadd.f32 %v973_v44, %v878_v43 }
 0x1af   : > { %v564_v46 = vpop.f32.mrf.mxu1 }
 0x1b0   : > { %v565_v47 = vadd.f32 %v878_v43, %v564_v46 }
 0x1b1   : > { %v976_v48 = vpop.f32.mrf.mxu1 }
 0x1b2   : > { %1051 = vtanh.f32 %v565_v47  ;;  %v580_v49 = vadd.f32 %v976_v48, %v878_v43 }
 0x1b3   : > { %1053 = vtanh.f32 %v570_v45  ;;  %v574_v50 = vpop.f32.mrf.mxu1 }
 0x1b4   : > { %v575_v51 = vadd.f32 %v878_v43, %v574_v50 }
 0x1b6   : > { %1055 = vtanh.f32 %v575_v51 }
 0x1b7   : > { %1057 = vtanh.f32 %v580_v49 }
 0x1bf   : > { %v1052_v52 = vpop.eup %1051 }
 0x1c0   : > { %v1054_v53 = vpop.eup %1053  ;;  %993 = vmatprep.mubr.msk.f32.mxu0 %vm602_vm1, %v1052_v52 }
 0x1c1   : > { %994 = vmatmul.mubr.msk.f32.vlgmr.msra.gmra.mxu0 %vm602_vm1, %v1054_v53 }
 0x1c3   : > { %v1056_v54 = vpop.eup %1055 }
 0x1c4   : > { %v1058_v55 = vpop.eup %1057  ;;  %996 = vmatprep.mubr.msk.f32.mxu0 %vm602_vm1, %v1056_v54 }
 0x1c5   : > { %997 = vmatmul.mubr.msk.f32.gmra.mxu0 %vm602_vm1, %v1058_v55 }
 0x281   : > { %v995_v58 = vpop.f32.mrf.mxu0 }
 0x282   : > { %v687_v59 = vadd.f32 %v995_v58, %v879_v57 }
 0x283   : > { %v681_v60 = vpop.f32.mrf.mxu0 }
 0x284   : > { %1059 = vtanh.f32 %v687_v59  ;;  %v682_v61 = vadd.f32 %v879_v57, %v681_v60  ;;  %751 = vperm.xlu1 %1042, %v687_v59  }
 0x285   : > { %v998_v62 = vpop.f32.mrf.mxu0 }
 0x286   : > { %1061 = vtanh.f32 %v682_v61  ;;  %v697_v1 = vadd.f32 %v998_v62, %v879_v57 }
 0x287   : > { %v691_v63 = vpop.f32.mrf.mxu0 }
 0x288   : > { %v692_v0 = vadd.f32 %v879_v57, %v691_v63  ;;  %1063 = vtanh.f32 %v697_v1 }
 0x28a   : > { %756 = vperm.xlu1 %1042, %v692_v0   ;;  %1065 = vtanh.f32 %v692_v0 }
 0x291   : > { %v1060_v3 = vpop.eup %1059 }
 0x292   : > { %v705_v5 = vsub.f32 %v361_v2, %v1060_v3 }
 0x293   : > { %v1062_v6 = vpop.eup %1061 }
 0x294   : > { %v709_v8 = vmul.f32 %v705_v5, %v705_v5  ;;  %v704_v9 = vsub.f32 %v360_v4, %v1062_v6 }
 0x295   : > { %v1064_v15 = vpop.eup %1063 }
 0x296   : > { %v720_v10 = vmul.f32 %v884_v7, %v709_v8  ;;  %v708_v11 = vmul.f32 %v704_v9, %v704_v9  ;;  %v707_v17 = vsub.f32 %v363_v16, %v1064_v15 }
 0x297   : > { %v1066_v18 = vpop.eup %1065 }
 0x298   : > { %v727_v12 = vsel %vm723_vm2, %v720_v10, 0.0  ;;  %v719_v13 = vmul.f32 %v884_v7, %v708_v11  ;;  %v711_v20 = vmul.f32 %v707_v17, %v707_v17  ;;  %v706_v21 = vsub.f32 %v362_v19, %v1066_v18 }
 0x299   : > { %728 = vadd.xlane.f32.xlu0 %v727_v12 }
 0x29a   : > { %v724_v14 = vsel %vm723_vm2, %v719_v13, 0.0  ;;  %v722_v22 = vmul.f32 %v884_v7, %v711_v20  ;;  %v710_v23 = vmul.f32 %v706_v21, %v706_v21 }
 0x29c   : > { %v733_v24 = vsel %vm723_vm2, %v722_v22, 0.0  ;;  %v721_v25 = vmul.f32 %v884_v7, %v710_v23 }
 0x29d   : > { %725 = vadd.xlane.f32.xlu0 %v724_v14 }
 0x29e   : > { %v730_v26 = vsel %vm723_vm2, %v721_v25, 0.0 }
 0x2ae   : > { %734 = vadd.xlane.f32.xlu1 %v733_v24 }
 0x2b2   : > { %731 = vadd.xlane.f32.xlu1 %v730_v26 }
 0x2b3   : > { %746 = vperm.xlu0 %1041, %v682_v61  }
 0x2c3   : > { %761 = vperm.xlu1 %1042, %v697_v1  }
 0x2ff   : > { %v752_v29 = vpop.permute.xlu1 %751 }
 0x300   : > { %v765_v32 = vsel %vm743_vm3, %v752_v29, 0.0 }
 0x305   : > { %v757_v39 = vpop.permute.xlu1 %756 }
 0x306   : > { %v766_v43 = vsel %vm743_vm3, %v757_v39, 0.0 }
 0x322   : > { %v729_v30 = vpop.xlane.xlu0 %728 }
 0x323   : > { %v737_v31 = vmul.f32 -0.5, %v729_v30 }
 0x325   : > { %v769_v33 = vsel %vm742_vm4, %v737_v31, %v765_v32 }
 0x326   : > { %773 = vst [vmem:[%s342_s28 + $0x8] sm:$0xff] %v769_v33  ;;  %v726_v34 = vpop.xlane.xlu0 %725 }
 0x327   : > { %v736_v35 = vmul.f32 -0.5, %v726_v34 }
 0x32e   : > { %v747_v36 = vpop.permute.xlu0 %746 }
 0x32f   : > { %v764_v37 = vsel %vm743_vm3, %v747_v36, 0.0 }
 0x330   : > { %v768_v38 = vsel %vm742_vm4, %v736_v35, %v764_v37 }
 0x331   : > { %772 = vst [vmem:[%s342_s28] sm:$0xff] %v768_v38 }
 0x337   : > { %v735_v40 = vpop.xlane.xlu1 %734 }
 0x338   : > { %v739_v45 = vmul.f32 -0.5, %v735_v40 }
 0x33b   : > { %v732_v41 = vpop.xlane.xlu1 %731 }
 0x33c   : > { %v738_v42 = vmul.f32 -0.5, %v732_v41 }
 0x33e   : > { %v770_v44 = vsel %vm742_vm4, %v738_v42, %v766_v43 }
 0x33f   : > { %774 = vst [vmem:[%s342_s28 + $0x10] sm:$0xff] %v770_v44  ;;  %v762_v46 = vpop.permute.xlu1 %761 }
 0x340   : > { %v767_v47 = vsel %vm743_vm3, %v762_v46, 0.0 }
 0x341   : > { %v771_v48 = vsel %vm742_vm4, %v739_v45, %v767_v47 }
 0x342   : > { %775 = vst [vmem:[%s342_s28 + $0x18] sm:$0xff] %v771_v48 }
 0x343   : > { %1080 = shalt.err (!%p1077_p3)
}
 0x344   : > { %s1081_s25 = scalar_lea.hbm %s1358_s21, 512  ;;  %s1085_s14 = scalar_lea.hbm %s1413_s9, 1024 }
 0x345   : > { %p1082_p4 = scmp.ne.s32.totalorder %s1358_s21, %s1081_s25  ;;  %p1086_p9 = scmp.lt.s32.totalorder %s1358_s21, %s1413_s9 }
 0x346   : > { %p1087_p10 = scmp.lt.s32.totalorder %s1085_s14, %s1081_s25 }
 0x347   : > { %p1083_p7 = pnand %p1082_p4, %p1221_p5 }
 0x348   : > { %p1088_p11 = por %p1087_p10, %p1086_p9 }
 0x349   : > { %p1084_p8 = pneg %p1083_p7 }
 0x34b   : > { %p1089_p12 = pnand %p1088_p11, %p1084_p8 }
 0x34d   : > { %1092 = shalt.err (!%p1089_p12)
}
 0x34e   : > { %s1131_s23 = smov 128   ;;  %s1132_s24 = smov 8  }
 0x34f   : > { %999 = dma.vmem_to_hbm [thread:$0]  (%p1221_p5), %s1353_s29, 512, %s1358_s21, %s1364_s13, %s1131_s23, %s1131_s23, %s1132_s24  }
 0x350 PF: > { %p1005_p13 = scmp.ge.s32.totalorder %s1127_s12, 2  ;;  %s805_s27 = sand.u32 1, %s1115_s30  }
 0x351   : > { %s806_s26 = scalar_lea.sflag [#allocation3], %s805_s27 }
 0x352   : > { %p1002_p0 = pnand %p1005_p13, %p1225_p6 }
 0x354   : > { %p1003_p1 = pneg %p1002_p0 }
 0x356   : > { %1110 = dma.done.wait (%p1003_p1), %s806_s26, 512  }
 0x357   : > { %1112 = vsyncadd (%p1003_p1), %s806_s26, 4294966784  ;;  %p19_p2 = scmp.ge.s32.totalorder %s1208_s15, 4   ;;  %s1416_s30 = smov %s1119_s10 }
 0x358   : > { %s1417_s10 = smov %s1123_s11  ;;  %s1418_s11 = smov %s1219_s18 }
 0x359   : > { %s1419_s12 = smov %s1208_s15  ;;  %21 = sbr.rel (!%p19_p2) target bundleno = 3 (0x3), region = 94 }
 0x35e   :  { %811 = vsyncpa [#allocation3], 1 }
 0x35f   :  { %813 = vsyncpa [#allocation3 + $0x1], 1 }

</bundles_post_ra>
